<compile_context>
chip_gen: v7x
topology: tpu7x:2x2x1
jax: 0.10.0
libtpu: 0.0.40
codegen_flags: <defaults>
</compile_context>

<pallas_src>
import functools

import jax
import jax.numpy as jnp
from jax import lax
from jax.experimental import pallas as pl
from jax.experimental.pallas import tpu as pltpu


# ----------------------------------------------------------------------------
# Kernel bodies
# ----------------------------------------------------------------------------

def _mlp_epilogue(pooled, w1t_ref, b1_ref, w2t_ref, b2_ref, o_ref):
    """pooled: (bt, C) f32 mean over H*W -> Linear/ReLU/Linear -> o_ref."""
    h = jnp.dot(pooled, w1t_ref[...], preferred_element_type=jnp.float32)
    h = jnp.maximum(h + b1_ref[...], 0.0)
    y = jnp.dot(h, w2t_ref[...], preferred_element_type=jnp.float32)
    y = y + b2_ref[...]
    o_ref[...] = y.reshape(o_ref.shape).astype(o_ref.dtype)


def _lane_partial_kernel(x_ref, w1t_ref, b1_ref, w2t_ref, b2_ref, o_ref,
                         acc_ref, *, inv_hw, hw_total, thw, n_slices,
                         needs_mask, unroll):
    """Main path: per-lane f32 partial sums; single XLU reduce in the epilogue.

    x_ref:   (bt, C, thw)   thw is a multiple of 128
    acc_ref: (bt, C, 128)   f32 per-lane running partial sums
    o_ref:   (bt, 1, O)
    """
    hw_idx = pl.program_id(1)

    @pl.when(hw_idx == 0)
    def _():
        acc_ref[...] = jnp.zeros_like(acc_ref)

    if needs_mask:
        lane = lax.broadcasted_iota(jnp.int32, (1, 1, 128), 2)
        base = hw_idx * thw

    def body(k, partial):
        off = pl.multiple_of(k * 128, 128)
        xs = x_ref[:, :, pl.ds(off, 128)].astype(jnp.float32)
        if needs_mask:
            gidx = base + k * 128 + lane            # global spatial index
            xs = jnp.where(gidx < hw_total, xs, 0.0)
        return partial + xs

    partial = lax.fori_loop(0, n_slices, body,
                            jnp.zeros(acc_ref.shape, jnp.float32),
                            unroll=unroll)
    acc_ref[...] += partial                          # pure VPU adds in hot loop

    @pl.when(hw_idx == pl.num_programs(1) - 1)
    def _():
        pooled = jnp.sum(acc_ref[...], axis=-1) * inv_hw     # one XLU reduce
        _mlp_epilogue(pooled, w1t_ref, b1_ref, w2t_ref, b2_ref, o_ref)


def _simple_kernel(x_ref, w1t_ref, b1_ref, w2t_ref, b2_ref, o_ref,
                   acc_ref, *, inv_hw):
    """Fallback for ragged H*W that fits in one tile (single spatial step)."""
    hw_idx = pl.program_id(1)

    @pl.when(hw_idx == 0)
    def _():
        acc_ref[...] = jnp.zeros_like(acc_ref)

    acc_ref[...] += jnp.sum(x_ref[...], axis=-1, dtype=jnp.float32)

    @pl.when(hw_idx == pl.num_programs(1) - 1)
    def _():
        pooled = acc_ref[...] * inv_hw
        _mlp_epilogue(pooled, w1t_ref, b1_ref, w2t_ref, b2_ref, o_ref)


# ----------------------------------------------------------------------------
# Host-side tiling / budgeting
# ----------------------------------------------------------------------------

def _vmem_capacity_bytes():
    try:
        return int(pltpu.get_tpu_info().vmem_capacity_bytes)
    except Exception:
        return 64 << 20          # conservative (v7x per-core VMEM)


def _largest_divisor_leq(n, cap):
    cap = max(1, min(n, cap))
    for d in range(cap, 0, -1):
        if n % d == 0:
            return d
    return 1


def _choose_tiles(B, C, HW, itemsize, budget):
    """Return (bt, thw, n_hw, lane_partial)."""
    row_bytes = C * HW * itemsize
    if row_bytes > budget and HW >= 256:
        # Spatial tiling: lane-aligned tile, cdiv grid, tail masked in-kernel.
        thw = max(128, (budget // (C * itemsize)) // 128 * 128)
        thw = min(thw, (HW // 128) * 128)
        return 1, thw, pl.cdiv(HW, thw), True

    # Full spatial extent per step.
    thw = HW
    bt_cap = min(B, max(1, budget // max(1, row_bytes)))
    if B >= 2:
        # Keep >= 2 batch blocks so both TensorCores work on megacore parts
        # (negligible cost on single-core chips: one extra ~0.35us grid step).
        bt_cap = min(bt_cap, max(1, B // 2))
    bt = _largest_divisor_leq(B, bt_cap)
    lane_partial = (HW % 128 == 0)
    return bt, thw, 1, lane_partial


# ----------------------------------------------------------------------------
# Public entry point
# ----------------------------------------------------------------------------

def polarization_mlp(x_nchw, w1, b1, w2, b2, *, block_budget_bytes=None):
    """x_nchw: (B, C, H, W); w1: (H1, C); b1: (H1,); w2: (O, H1); b2: (O,)."""
    B, C, H, W = x_nchw.shape
    H1, Cin = w1.shape
    Odim, H1b = w2.shape
    assert Cin == C and H1b == H1
    HW = H * W
    itemsize = jnp.dtype(x_nchw.dtype).itemsize

    # Generation-aware budgets.
    vmem_cap = _vmem_capacity_bytes()                 # 128 MiB v5e/v6e, 64 MiB v7x
    limit_cap = min((vmem_cap * 3) // 4, 112 << 20)   # per-core scoped ceiling
    if block_budget_bytes is None:
        block_budget_bytes = (20 << 20) if vmem_cap >= (96 << 20) else (8 << 20)
    # Two double-buffered x blocks must always fit under the limit.
    eff_budget = min(block_budget_bytes, max(1 << 20, (limit_cap - (8 << 20)) // 2))

    # Host-side layout plumbing (no in-kernel relayout).
    x = x_nchw.reshape(B, C, HW)
    w1t = jnp.asarray(w1).T                  # (C, H1)
    w2t = jnp.asarray(w2).T                  # (H1, O)
    b1r = jnp.asarray(b1).reshape(1, H1)
    b2r = jnp.asarray(b2).reshape(1, Odim)

    bt, thw, n_hw, lane_partial = _choose_tiles(B, C, HW, itemsize, eff_budget)
    n_b = B // bt

    # Explicit VMEM accounting; fail loudly rather than silently clamping.
    x_block_bytes = bt * C * thw * itemsize
    acc_bytes = bt * C * (128 if lane_partial else 1) * 4
    w_bytes = sum(int(a.size) * a.dtype.itemsize for a in (w1t, b1r, w2t, b2r))
    out_block_bytes = bt * max(Odim, 128) * itemsize
    vmem_need = (2 * x_block_bytes + 2 * w_bytes + acc_bytes
                 + 2 * out_block_bytes + (2 << 20))
    if vmem_need > limit_cap:
        raise ValueError(
            f"PolarizationMLP kernel needs ~{vmem_need} B of VMEM but the "
            f"per-core cap is {limit_cap} B; reduce block_budget_bytes.")
    vmem_limit = int(min(max(vmem_need, 16 << 20), limit_cap))

    cost = pl.CostEstimate(
        flops=int(B * C * HW + 2 * B * C * H1 + 2 * B * H1 * Odim),
        transcendentals=0,
        bytes_accessed=int(x.size * itemsize + B * Odim * itemsize + w_bytes),
    )

    if lane_partial:
        n_slices = thw // 128
        needs_mask = (n_hw * thw != HW)
        unroll = n_slices if n_slices <= 16 else 8
        kernel = functools.partial(
            _lane_partial_kernel, inv_hw=float(1.0 / HW), hw_total=HW,
            thw=thw, n_slices=n_slices, needs_mask=needs_mask, unroll=unroll)
        acc_shape = (bt, C, 128)
    else:
        kernel = functools.partial(_simple_kernel, inv_hw=float(1.0 / HW))
        acc_shape = (bt, C)

    out3 = pl.pallas_call(
        kernel,
        out_shape=jax.ShapeDtypeStruct((B, 1, Odim), x.dtype),
        grid_spec=pltpu.PrefetchScalarGridSpec(
            num_scalar_prefetch=0,
            grid=(n_b, n_hw),                                # reduction axis last
            in_specs=[
                pl.BlockSpec((bt, C, thw), lambda i, j: (i, 0, j)),
                pl.BlockSpec((C, H1), lambda i, j: (0, 0)),   # VMEM-resident
                pl.BlockSpec((1, H1), lambda i, j: (0, 0)),
                pl.BlockSpec((H1, Odim), lambda i, j: (0, 0)),
                pl.BlockSpec((1, Odim), lambda i, j: (0, 0)),
            ],
            out_specs=pl.BlockSpec((bt, 1, Odim), lambda i, j: (i, 0, 0)),
            scratch_shapes=[pltpu.VMEM(acc_shape, jnp.float32)],
        ),
        compiler_params=pltpu.CompilerParams(
            dimension_semantics=("parallel", "arbitrary"),
            vmem_limit_bytes=vmem_limit,
        ),
        cost_estimate=cost,
    )(x, w1t, b1r, w2t, b2r)
    return out3.reshape(B, Odim)


def _reference(x_nchw, w1, b1, w2, b2):
    pooled = jnp.mean(x_nchw, axis=(2, 3))                   # (B, C)
    h = jnp.maximum(pooled @ w1.T + b1, 0.0)                 # (B, H1)
    return h @ w2.T + b2                                     # (B, O)


if __name__ == "__main__":
    B, C, OUT, H, W = 2, 16, 8, 16, 16   # in_channels=16, out_channels=8

    key = jax.random.PRNGKey(0)
    kx, k1, k2, k3, k4 = jax.random.split(key, 5)

    x = jax.random.normal(kx, (B, C, H, W), dtype=jnp.float32)
    w1 = jax.random.normal(k1, (OUT, C), dtype=jnp.float32) * 0.1    # Linear(C, OUT)
    b1 = jax.random.normal(k2, (OUT,), dtype=jnp.float32) * 0.1
    w2 = jax.random.normal(k3, (OUT, OUT), dtype=jnp.float32) * 0.1  # Linear(OUT, OUT)
    b2 = jax.random.normal(k4, (OUT,), dtype=jnp.float32) * 0.1

    out = polarization_mlp(x, w1, b1, w2, b2)
    out = jax.block_until_ready(out)

    ref = _reference(x, w1, b1, w2, b2)
    assert out.shape == (B, OUT)
    assert jnp.allclose(out, ref, atol=1e-5, rtol=1e-5), "mismatch vs reference"

    print("KERNEL_OK")
</pallas_src>

<mosaic_0001>
module attributes {stable_mosaic.version = 11 : i64} {
  func.func @_lane_partial_kernel(%arg0: i32, %arg1: i32, %arg2: memref<1x16x256xf32, #tpu.memory_space<vmem>>, %arg3: memref<16x8xf32, #tpu.memory_space<vmem>>, %arg4: memref<1x8xf32, #tpu.memory_space<vmem>>, %arg5: memref<8x8xf32, #tpu.memory_space<vmem>>, %arg6: memref<1x8xf32, #tpu.memory_space<vmem>>, %arg7: memref<1x1x8xf32, #tpu.memory_space<vmem>>, %arg8: memref<1x16x128xf32, #tpu.memory_space<vmem>>) attributes {dimension_semantics = [#tpu.dimension_semantics<parallel>, #tpu.dimension_semantics<arbitrary>], iteration_bounds = array<i64: 2, 1>, scalar_prefetch = 0 : i64, scratch_operands = 1 : i64, tpu.core_type = #tpu.core_type<tc>, window_params = [{transform_indices = @transform_0, window_bounds = array<i64: 1, 16, 256>}, {pipeline_mode = #tpu.pipeline_mode<synchronous>, transform_indices = @transform_1, window_bounds = array<i64: 16, 8>}, {pipeline_mode = #tpu.pipeline_mode<synchronous>, transform_indices = @transform_2, window_bounds = array<i64: 1, 8>}, {pipeline_mode = #tpu.pipeline_mode<synchronous>, transform_indices = @transform_3, window_bounds = array<i64: 8, 8>}, {pipeline_mode = #tpu.pipeline_mode<synchronous>, transform_indices = @transform_4, window_bounds = array<i64: 1, 8>}, {transform_indices = @transform_5, window_bounds = array<i64: 1, 1, 8>}]} {
    %c0_i32 = arith.constant 0 : i32
    %0 = arith.cmpi eq, %arg1, %c0_i32 : i32
    %1 = arith.extui %0 : i1 to i32
    %c0_i32_0 = arith.constant 0 : i32
    %2 = arith.cmpi ne, %1, %c0_i32_0 : i32
    scf.if %2 {
      %cst_14 = arith.constant 0.000000e+00 : f32
      %20 = vector.broadcast %cst_14 : f32 to vector<1x16x128xf32>
      %c0_15 = arith.constant 0 : index
      %c0_16 = arith.constant 0 : index
      %c0_17 = arith.constant 0 : index
      %21 = vector.load %arg8[%c0_15, %c0_16, %c0_17] : memref<1x16x128xf32, #tpu.memory_space<vmem>>, vector<1x16x128xf32>
      tpu.vector_store %arg8[%c0_15, %c0_16, %c0_17], %20 {strides = array<i32>} : memref<1x16x128xf32, #tpu.memory_space<vmem>>, vector<1x16x128xf32>,
    } else {
    }
    %cst = arith.constant 0.000000e+00 : f32
    %3 = vector.broadcast %cst : f32 to vector<1x16x128xf32>
    %c0_i32_1 = arith.constant 0 : i32
    %c128_i32 = arith.constant 128 : i32
    %4 = arith.muli %c0_i32_1, %c128_i32 : i32
    %5 = tpu.assume_multiple %4, 128 : i32
    %c0 = arith.constant 0 : index
    %c0_2 = arith.constant 0 : index
    %6 = arith.index_cast %5 : i32 to index
    %7 = vector.load %arg2[%c0, %c0_2, %6] : memref<1x16x256xf32, #tpu.memory_space<vmem>>, vector<1x16x128xf32>
    %8 = arith.addf %3, %7 : vector<1x16x128xf32>
    %c1_i32 = arith.constant 1 : i32
    %c128_i32_3 = arith.constant 128 : i32
    %9 = arith.muli %c1_i32, %c128_i32_3 : i32
    %10 = tpu.assume_multiple %9, 128 : i32
    %c0_4 = arith.constant 0 : index
    %c0_5 = arith.constant 0 : index
    %11 = arith.index_cast %10 : i32 to index
    %12 = vector.load %arg2[%c0_4, %c0_5, %11] : memref<1x16x256xf32, #tpu.memory_space<vmem>>, vector<1x16x128xf32>
    %13 = arith.addf %8, %12 : vector<1x16x128xf32>
    %c2_i32 = arith.constant 2 : i32
    %c0_6 = arith.constant 0 : index
    %c0_7 = arith.constant 0 : index
    %c0_8 = arith.constant 0 : index
    %14 = vector.load %arg8[%c0_6, %c0_7, %c0_8] : memref<1x16x128xf32, #tpu.memory_space<vmem>>, vector<1x16x128xf32>
    %15 = arith.addf %14, %13 : vector<1x16x128xf32>
    %c0_9 = arith.constant 0 : index
    %c0_10 = arith.constant 0 : index
    %c0_11 = arith.constant 0 : index
    %16 = vector.load %arg8[%c0_9, %c0_10, %c0_11] : memref<1x16x128xf32, #tpu.memory_space<vmem>>, vector<1x16x128xf32>
    tpu.vector_store %arg8[%c0_9, %c0_10, %c0_11], %15 {strides = array<i32>} : memref<1x16x128xf32, #tpu.memory_space<vmem>>, vector<1x16x128xf32>,
    %c0_i32_12 = arith.constant 0 : i32
    %17 = arith.cmpi eq, %arg1, %c0_i32_12 : i32
    %18 = arith.extui %17 : i1 to i32
    %c0_i32_13 = arith.constant 0 : i32
    %19 = arith.cmpi ne, %18, %c0_i32_13 : i32
    scf.if %19 {
      %c0_14 = arith.constant 0 : index
      %c0_15 = arith.constant 0 : index
      %c0_16 = arith.constant 0 : index
      %20 = vector.load %arg8[%c0_14, %c0_15, %c0_16] : memref<1x16x128xf32, #tpu.memory_space<vmem>>, vector<1x16x128xf32>
      %cst_17 = arith.constant dense<0.000000e+00> : vector<1x16xf32>
      %21 = vector.multi_reduction <add>, %20, %cst_17 [2] : vector<1x16x128xf32> to vector<1x16xf32>
      %cst_18 = arith.constant 3.906250e-03 : f32
      %22 = vector.broadcast %cst_18 : f32 to vector<1x16xf32>
      %23 = arith.mulf %21, %22 : vector<1x16xf32>
      %c0_19 = arith.constant 0 : index
      %c0_20 = arith.constant 0 : index
      %24 = vector.load %arg3[%c0_19, %c0_20] : memref<16x8xf32, #tpu.memory_space<vmem>>, vector<16x8xf32>
      %cst_21 = arith.constant dense<0.000000e+00> : vector<1x8xf32>
      %25 = tpu.matmul %23, %24, %cst_21 {dimension_numbers = #tpu.dot_dimension_numbers<[1], [0], [0], [1], [0, 0, 1, 1], [], []>} : vector<1x16xf32>, vector<16x8xf32>, vector<1x8xf32> -> vector<1x8xf32>
      %c0_22 = arith.constant 0 : index
      %c0_23 = arith.constant 0 : index
      %26 = vector.load %arg4[%c0_22, %c0_23] : memref<1x8xf32, #tpu.memory_space<vmem>>, vector<1x8xf32>
      %27 = arith.addf %25, %26 : vector<1x8xf32>
      %cst_24 = arith.constant 0.000000e+00 : f32
      %28 = vector.broadcast %cst_24 : f32 to vector<1x8xf32>
      %29 = arith.maximumf %27, %28 : vector<1x8xf32>
      %c0_25 = arith.constant 0 : index
      %c0_26 = arith.constant 0 : index
      %30 = vector.load %arg5[%c0_25, %c0_26] : memref<8x8xf32, #tpu.memory_space<vmem>>, vector<8x8xf32>
      %cst_27 = arith.constant dense<0.000000e+00> : vector<1x8xf32>
      %31 = tpu.matmul %29, %30, %cst_27 {dimension_numbers = #tpu.dot_dimension_numbers<[1], [0], [0], [1], [0, 0, 1, 1], [], []>} : vector<1x8xf32>, vector<8x8xf32>, vector<1x8xf32> -> vector<1x8xf32>
      %c0_28 = arith.constant 0 : index
      %c0_29 = arith.constant 0 : index
      %32 = vector.load %arg6[%c0_28, %c0_29] : memref<1x8xf32, #tpu.memory_space<vmem>>, vector<1x8xf32>
      %33 = arith.addf %31, %32 : vector<1x8xf32>
      %34 = vector.shape_cast %33 : vector<1x8xf32> to vector<1x1x8xf32>
      %c0_30 = arith.constant 0 : index
      %c0_31 = arith.constant 0 : index
      %c0_32 = arith.constant 0 : index
      %35 = vector.load %arg7[%c0_30, %c0_31, %c0_32] : memref<1x1x8xf32, #tpu.memory_space<vmem>>, vector<1x1x8xf32>
      tpu.vector_store %arg7[%c0_30, %c0_31, %c0_32], %34 {strides = array<i32>} : memref<1x1x8xf32, #tpu.memory_space<vmem>>, vector<1x1x8xf32>,
    } else {
    }
    return
  }
  func.func @transform_0(%arg0: i32, %arg1: i32) -> (i32, i32, i32) {
    %c0_i32 = arith.constant 0 : i32
    %c0_i32_0 = arith.constant 0 : i32
    return %arg0, %c0_i32, %arg1 : i32, i32, i32
  }
  func.func @transform_1(%arg0: i32, %arg1: i32) -> (i32, i32) {
    %c0_i32 = arith.constant 0 : i32
    %c0_i32_0 = arith.constant 0 : i32
    %c0_i32_1 = arith.constant 0 : i32
    return %c0_i32, %c0_i32_0 : i32, i32
  }
  func.func @transform_2(%arg0: i32, %arg1: i32) -> (i32, i32) {
    %c0_i32 = arith.constant 0 : i32
    %c0_i32_0 = arith.constant 0 : i32
    %c0_i32_1 = arith.constant 0 : i32
    return %c0_i32, %c0_i32_0 : i32, i32
  }
  func.func @transform_3(%arg0: i32, %arg1: i32) -> (i32, i32) {
    %c0_i32 = arith.constant 0 : i32
    %c0_i32_0 = arith.constant 0 : i32
    %c0_i32_1 = arith.constant 0 : i32
    return %c0_i32, %c0_i32_0 : i32, i32
  }
  func.func @transform_4(%arg0: i32, %arg1: i32) -> (i32, i32) {
    %c0_i32 = arith.constant 0 : i32
    %c0_i32_0 = arith.constant 0 : i32
    %c0_i32_1 = arith.constant 0 : i32
    return %c0_i32, %c0_i32_0 : i32, i32
  }
  func.func @transform_5(%arg0: i32, %arg1: i32) -> (i32, i32, i32) {
    %c0_i32 = arith.constant 0 : i32
    %c0_i32_0 = arith.constant 0 : i32
    %c0_i32_1 = arith.constant 0 : i32
    return %arg0, %c0_i32, %c0_i32_0 : i32, i32, i32
  }
}

</mosaic_0001>

<bundles_post_ra>
// kernel: tpu_custom_call.1
= control target key start
LH: loop header
LB: loop body
LE: loop exit
PB: predicated region body
PF: predicated region fallthrough
CT: control target
= control target key end

     0   :  { %10 = vsyncpa [#allocation4], 0  ;;  %s995_s0 = inlined_call_operand.hbm [shape: f32[2,16,256], index: 0, kind: input, shape index: {}]   ;;  %s996_s1 = inlined_call_operand.vmem [shape: f32[16,8], index: 1, kind: input, shape index: {}]   ;;  %s997_s2 = inlined_call_operand.vmem [shape: f32[1,8], index: 2, kind: input, shape index: {}]   ;;  %s998_s3 = inlined_call_operand.vmem [shape: f32[8,8], index: 3, kind: input, shape index: {}]   ;;  %s999_s4 = inlined_call_operand.vmem [shape: f32[1,8], index: 4, kind: input, shape index: {}]   ;;  %s1000_s5 = inlined_call_operand.hbm [shape: f32[2,1,8], index: 5, kind: output, shape index: {}]  }
   0x1   :  { %12 = vsyncpa [#allocation4 + $0x1], 0 }
   0x2   :  { %13 = vsyncpa [#allocation5], 0 }
   0x3   :  { %15 = vsyncpa [#allocation5 + $0x1], 0  ;;  %s806_s18 = smov 0   ;;  %s808_s19 = smov 0  }
   0x4   :  { %s810_s20 = smov 0   ;;  %s812_s21 = smov 0  }
   0x5   :  { %s814_s22 = smov 0   ;;  %s816_s23 = smov 0  }
   0x6 LB: > { %s551_s24 = sadd.s32 4294967295, %s767_s23   ;;  %s552_s25 = sadd.s32 4294967294, %s767_s23   ;;  %s767_s23 = sphi %s816_s23, %s21_s23   ;;  %s763_s22 = sphi %s814_s22, %s1015_s22   ;;  %s759_s21 = sphi %s812_s21, %s1014_s21   ;;  %s755_s20 = sphi %s810_s20, %s1013_s20   ;;  %s751_s19 = sphi %s808_s19, %s1012_s19   ;;  %s747_s18 = sphi %s806_s18, %s1011_s18  }
   0x7   : > { %s33_s26 = sadd.s32 1, %s763_s22  ;;  %s42_s27 = sadd.s32 1, %s755_s20 }
   0x8   : > { %p35_p0 = scmp.ge.s32.totalorder %s33_s26, 2  ;;  %p49_p1 = scmp.ne.s32.totalorder %s755_s20, %s751_s19 }
   0x9   : > { %p50_p2 = scmp.eq.s32.totalorder %s767_s23, 0  ;;  %p55_p3 = scmp.ne.s32.totalorder %s751_s19, %s747_s18 }
   0xa   : > { %s1017_s26 = smov (%p35_p0, %s33_s26), 0  ;;  %p56_p5 = scmp.eq.s32.totalorder %s551_s24, 0 }
   0xb   : > { %p847_p4 = por %p50_p2, %p49_p1  ;;  %s37_s29 = ssub.s32 %s763_s22, %s1017_s26 }
   0xc   : > { %p163_p6 = scmp.eq.s32.totalorder %s551_s24, 1  ;;  %p40_p7 = scmp.eq.s32.totalorder %s37_s29, 0 }
   0xd   : > { %p853_p8 = por %p56_p5, %p55_p3  ;;  %p169_p10 = scmp.eq.s32.totalorder %s552_s25, 1 }
   0xe   : > { %p857_p9 = por %p163_p6, %p49_p1  ;;  %p600_p13 = scmp.lt.s32.totalorder %s767_s23, 2 }
   0xf   : > { %s862_s7 = scalar_select %p40_p7, %s755_s20, %s42_s27  }
  0x10   : > { %s1004_s6 = scalar_select %p857_p9, 1, 0 }
  0x11   : > { %p864_p11 = por %p169_p10, %p55_p3  ;;  %s201_s9 = sand.u32 1, %s755_s20  }
  0x12   : > { %s555_s10 = sshll.u32 %s201_s9, 5  ;;  %s567_s11 = sshll.u32 %s763_s22, 9 }
  0x13   : > { %s1005_s8 = scalar_select %p864_p11, 1, 0 }
  0x14   : > { %s875_s14 = scalar_lea.hbm %s995_s0, %s567_s11  ;;  %s205_s15 = scalar_lea.vmem [#allocation3], %s555_s10 }
  0x15   : > { %s214_s16 = sshll.u32 %s205_s15, 4  ;;  %p881_p0 = pnand %p600_p13, %p847_p4  ;;  %s877_s16 = int_to_ptr.vmem [resolvable:$true] %s214_s16 }
  0x16   : > { %s886_s24 = scalar_lea.sflag [#allocation4], %s201_s9  ;;  %s655_s25 = scalar_lea.hbm %s875_s14, 512 }
  0x17   : > { %p656_p2 = scmp.ne.s32.totalorder %s875_s14, %s655_s25  ;;  %p657_p3 = pneg %p881_p0 }
  0x18   : > { %s660_s28 = scalar_lea.hbm %s995_s0, 1024  ;;  %p661_p4 = scmp.lt.u32.totalorder %s875_s14, %s995_s0 }
  0x19   : > { %p658_p5 = pnand %p657_p3, %p656_p2  ;;  %p662_p7 = scmp.lt.u32.totalorder %s660_s28, %s655_s25 }
  0x1a   : > { %p664_p13 = scmp.lt.u32.totalorder %s655_s25, %s875_s14 }
  0x1b   : > { %p659_p6 = pneg %p658_p5  ;;  %p663_p10 = por %p662_p7, %p661_p4 }
  0x1d   : > { %p665_p12 = por %p664_p13, %p663_p10 }
  0x1f   : > { %p666_p1 = pnand %p665_p12, %p659_p6 }
  0x21   : > { %669 = shalt.err (!%p666_p1)
}
  0x22   : > { %s670_s9 = scalar_lea.vmem %s877_s16, 512  ;;  %s769_s12 = smov [#allocation3]  }
  0x23   : > { %p671_p2 = scmp.ne.s32.totalorder %s877_s16, %s670_s9  ;;  %s675_s13 = sshll.u32 %s769_s12, 4  ;;  %s676_s13 = int_to_ptr.vmem [resolvable:$false] %s675_s13 }
  0x24   : > { %s677_s15 = scalar_lea.vmem %s676_s13, 1024  ;;  %p678_p9 = scmp.lt.s32.totalorder %s877_s16, %s676_s13 }
  0x25   : > { %p673_p5 = pnand %p671_p2, %p657_p3  ;;  %p679_p4 = scmp.lt.s32.totalorder %s677_s15, %s670_s9 }
  0x27   : > { %p674_p11 = pneg %p673_p5  ;;  %p680_p7 = por %p679_p4, %p678_p9 }
  0x29   : > { %p681_p10 = pnand %p680_p7, %p674_p11 }
  0x2b   : > { %684 = shalt.err (!%p681_p10)
}
  0x2c   : > { %s770_s25 = smov 256   ;;  %s771_s27 = smov 16  }
  0x2d   : > { %595 = dma.hbm_to_vmem [thread:$0]  (!%p881_p0), %s875_s14, 512, %s877_s16, %s886_s24, %s770_s25, %s770_s25, %s771_s27  }
  0x2e   : > { %p222_p12 = scmp.lt.s32.totalorder %s767_s23, 3  ;;  %p1007_p1 = scmp.ge.s32.totalorder %s767_s23, 1 }
  0x30   : > { %p223_p3 = pnand %p1007_p1, %p222_p12 }
  0x31   : > { %s918_s29 = sand.u32 (!%p223_p3), 1, %s751_s19  }
  0x32   : > { %226 = sbr.rel (%p223_p3) target bundleno = 656 (0x290), region = 40  ;;  %s559_s28 = sshll.u32 (!%p223_p3), %s918_s29, 5 }
  0x33   : > { %s229_s10 = scalar_lea.sflag (!%p223_p3), [#allocation4], %s918_s29  ;;  %s232_s11 = scalar_lea.vmem (!%p223_p3), [#allocation3], %s559_s28 }
  0x39   : > { %738 = dma.done.wait (%p853_p8), %s229_s10, 512  }
  0x3a   : > { %740 = vsyncadd (%p853_p8), %s229_s10, 4294966784  ;;  %v265_v0 = vld [vmem:[%s232_s11] sm:$0xff]  ;;  %v560_v1 = vld [vmem:[%s232_s11 + $0x8] sm:$0xff]  ;;  %v772_v9 = vmov 0.0|0.0   ;;  %vm773_vm0 = vmmov 0   ;;  %v774_v10 = vmov 0.0   ;;  %v296_v11 = vlaneseq }
  0x3b   : > { %v266_v2 = vld [vmem:[%s232_s11 + $0x10] sm:$0xff]  ;;  %v272_v3 = vadd.f32 %v560_v1, %v265_v0  ;;  %v561_v4 = vld [vmem:[%s232_s11 + $0x18] sm:$0xff]  ;;  %v291_v6 = vld [vmem:[%s996_s1] sm:$0xff]  ;;  %585 = vmatprep.subr.bf16.mxu0 %v772_v9  ;;  %577 = vmatprep.mubr.msk.f32.mxu0 %vm773_vm0, %v774_v10  ;;  %vm307_vm1 = vcmask 130112   ;;  %vm309_vm2 = vcmask 130048   ;;  %vm385_vm3 = vcmask 64512  }
  0x3c   : > { %v273_v5 = vadd.f32 %v561_v4, %v266_v2  ;;  %v292_v7 = vld [vmem:[%s996_s1 + $0x8] sm:$0xff]  ;;  %580 = vmatprep.subr.mxu1 %v774_v10  ;;  %582 = vmatprep.mubr.msk.f32.mxu1 %vm773_vm0, %v774_v10  ;;  %v297_v12 = vand.u32 127, %v296_v11  ;;  %v299_v13 = vshrl.u32 %v296_v11, 7  ;;  %v383_v24 = vld [vmem:[%s998_s3] sm:$0xff]  ;;  %s564_s27 = sshll.u32 %s759_s21, 4  ;;  %s257_s28 = scalar_lea.vmem [#allocation6], %s918_s29 }
  0x3d   : > { %285 = vadd.xlane.f32.xlu0 %v272_v3  ;;  %v586_v8 = vpack.c.bf16 %v292_v7, %v291_v6  ;;  %581 = vmatpush3.msra.mxu1 %v383_v24  ;;  %v293_v25 = vld [vmem:[%s997_s2] sm:$0x1]  ;;  %s474_s10 = sshll.u32 %s257_s28, 4  ;;  %vm459_vm4 = vcmask 57344   ;;  %s946_s16 = scalar_lea.hbm %s1000_s5, %s564_s27  ;;  %s948_s10 = int_to_ptr.vmem [resolvable:$true] %s474_s10 }
  0x3e   : > { %v302_v14 = vadd.s32 4294967288, %v297_v12  ;;  %v300_v16 = vsub.s32 %v297_v12, %v299_v13  ;;  %v384_v30 = vld [vmem:[%s999_s4] sm:$0x1]  ;;  %s462_s17 = scalar_lea.sflag [#allocation5], %s918_s29  ;;  %s685_s24 = scalar_lea.vmem %s948_s10, 16 }
  0x3f   : > { %587 = vmatpush3.bf16.msra.mxu0 %v586_v8  ;;  %p686_p8 = scmp.ne.s32.totalorder %s948_s10, %s685_s24  ;;  %p1008_p9 = scmp.ne.s32.totalorder %s1004_s6, 0 }
  0x40   : > { %v305_v18 = vsub.s32 %v302_v14, %v299_v13  ;;  %s775_s21 = smov [#allocation6]  }
  0x41   : > { %287 = vadd.xlane.f32.xlu0 %v273_v5  ;;  %p687_p11 = pnand %p686_p8, %p1008_p9  ;;  %s689_s30 = sshll.u32 %s775_s21, 4  ;;  %s690_s30 = int_to_ptr.vmem [resolvable:$false] %s689_s30 }
  0x42   : > { %s691_s9 = scalar_lea.vmem %s690_s30, 32  ;;  %p692_p6 = scmp.lt.s32.totalorder %s948_s10, %s690_s30 }
  0x43   : > { %p688_p0 = pneg %p687_p11  ;;  %p693_p13 = scmp.lt.s32.totalorder %s691_s9, %s685_s24 }
  0x45   : > { %p694_p2 = por %p693_p13, %p692_p6 }
  0x47   : > { %p695_p5 = pnand %p694_p2, %p688_p0 }
  0xca   : > { %v286_v15 = vpop.xlane.xlu0 %285 }
  0xcb   : > { %v289_v17 = vmul.f32 0.00390625, %v286_v15 }
  0xcd   : > { %v301_v21 = vrot.slane %v289_v17, %v300_v16 }
  0xce   : > { %v288_v19 = vpop.xlane.xlu0 %287 }
  0xcf   : > { %v290_v20 = vmul.f32 0.00390625, %v288_v19 }
  0xd1   : > { %v306_v22 = vrot.slane %v290_v20, %v305_v18 }
  0xd3   : > { %v308_v23 = vsel %vm307_vm1, %v306_v22, %v301_v21 }
  0xd4   : > { %578 = vmatmul.mubr.msk.f32.vlgmr.msra.gmra.mrb[0].mxu0 %vm309_vm2, %v308_v23 }
 0x1a7   : > { %v378_v26 = vpop.f32.mrb[0].mxu0 }
 0x1a8   : > { %v379_v27 = vadd.f32 %v378_v26, %v293_v25  ;;  %v579_v28 = vpop.f32.mrb[1].mxu0 }
 0x1aa   : > { %v382_v29 = vmax.f32 %v379_v27, 0.0 }
 0x1ac   : > { %583 = vmatmul.mubr.msk.f32.vlgmr.msra.gmra.mrb[0].mxu1 %vm385_vm3, %v382_v29 }
 0x27f   : > { %v455_v31 = vpop.f32.mrb[0].mxu1 }
 0x280   : > { %v456_v32 = vadd.f32 %v455_v31, %v384_v30  ;;  %v584_v33 = vpop.f32.mrb[1].mxu1 }
 0x282   : > { %460 = vst.msk [vmem:[%s257_s28] sm:$0x1] %vm459_vm4, %v456_v32 }
 0x283   : > { %698 = shalt.err (!%p695_p5)
}
 0x284   : > { %s699_s29 = scalar_lea.hbm %s946_s16, 16  ;;  %s703_s15 = scalar_lea.hbm %s1000_s5, 32 }
 0x285   : > { %p700_p4 = scmp.ne.s32.totalorder %s946_s16, %s699_s29  ;;  %p704_p12 = scmp.lt.u32.totalorder %s946_s16, %s1000_s5 }
 0x286   : > { %p705_p1 = scmp.lt.u32.totalorder %s703_s15, %s699_s29  ;;  %p707_p8 = scmp.lt.u32.totalorder %s699_s29, %s946_s16 }
 0x287   : > { %p701_p7 = pnand %p700_p4, %p1008_p9 }
 0x288   : > { %p706_p3 = por %p705_p1, %p704_p12 }
 0x289   : > { %p702_p10 = pneg %p701_p7 }
 0x28a   : > { %p708_p11 = por %p707_p8, %p706_p3 }
 0x28c   : > { %p709_p0 = pnand %p708_p11, %p702_p10 }
 0x28e   : > { %712 = shalt.err (!%p709_p0)
}
 0x28f   : > { %590 = dma.vmem_to_hbm [thread:$0]  (%p1008_p9), %s948_s10, 16, %s946_s16, %s462_s17  }
 0x290 PF: > { %s486_s28 = sand.u32 1, %s747_s18   ;;  %p1009_p6 = scmp.ne.s32.totalorder %s1005_s8, 0 }
 0x291   : > { %p1010_p13 = scmp.ge.s32.totalorder %s767_s23, 2  ;;  %s487_s11 = scalar_lea.sflag [#allocation5], %s486_s28 }
 0x293   : > { %p597_p2 = pnand %p1010_p13, %p1009_p6 }
 0x295   : > { %742 = dma.done.wait (!%p597_p2), %s487_s11, 16  }
 0x296   : > { %744 = vsyncadd (!%p597_p2), %s487_s11, 4294967280  ;;  %s21_s23 = sadd.s32 1, %s767_s23   ;;  %s1011_s18 = smov %s751_s19 }
 0x297   : > { %p18_p5 = scmp.ge.s32.totalorder %s21_s23, 4   ;;  %s1012_s19 = smov %s755_s20 }
 0x298   : > { %s1013_s20 = smov %s862_s7  ;;  %s1014_s21 = smov %s763_s22 }
 0x299   : > { %s1015_s22 = smov %s1017_s26  ;;  %20 = sbr.rel (!%p18_p5) target bundleno = 6 (0x6), region = 94 }
 0x2a0   :  { %491 = vsyncpa [#allocation4], 1 }
 0x2a1   :  { %493 = vsyncpa [#allocation4 + $0x1], 1 }
 0x2a2   :  { %494 = vsyncpa [#allocation5], 1 }
 0x2a3   :  { %496 = vsyncpa [#allocation5 + $0x1], 1 }

</bundles_post_ra>
